<compile_context>
chip_gen: v7x
topology: tpu7x:2x2x1
jax: 0.10.0
libtpu: 0.0.40
codegen_flags: <defaults>
</compile_context>

<pallas_src>
import jax
import jax.numpy as jnp
from jax.experimental import pallas as pl
from jax.experimental.pallas import tpu as pltpu

# ----------------------------- config ---------------------------------------
BATCH = 8
INPUT_SIZE = 16
HIDDEN = 32
LATENT = 8


# ----------------------------- kernel ---------------------------------------
def vae_kernel(
    x_ref,      # (B, I)
    eps_ref,    # (B, L)   standard-normal noise
    w1_ref,     # (I, H)   pre-transposed
    b1_ref,     # (1, H)
    w21_ref,    # (H, L)
    b21_ref,    # (1, L)
    w22_ref,    # (H, L)
    b22_ref,    # (1, L)
    w3_ref,     # (L, H)
    b3_ref,     # (1, H)
    w4_ref,     # (H, I)
    b4_ref,     # (1, I)
    out_ref,    # (B, I)   reconstruction
    kl_ref,     # (1, 1)   KL divergence (self.kl in the PyTorch module)
):
    x = x_ref[...]

    # ---- encode ----
    h1 = jnp.dot(x, w1_ref[...], preferred_element_type=jnp.float32) + b1_ref[...]
    h1 = jnp.maximum(h1, 0.0)                                   # ReLU
    mu = jnp.dot(h1, w21_ref[...], preferred_element_type=jnp.float32) + b21_ref[...]
    sigma = jnp.dot(h1, w22_ref[...], preferred_element_type=jnp.float32) + b22_ref[...]

    # ---- reparameterize ----
    z = mu + sigma * eps_ref[...]
    sig2 = sigma * sigma
    kl_ref[...] = 0.5 * jnp.sum(sig2 + mu * mu - jnp.log(sig2) - 1.0,
                                axis=(0, 1), keepdims=True)

    # ---- decode ----
    h3 = jnp.dot(z, w3_ref[...], preferred_element_type=jnp.float32) + b3_ref[...]
    h3 = jnp.maximum(h3, 0.0)                                   # ReLU
    logits = jnp.dot(h3, w4_ref[...], preferred_element_type=jnp.float32) + b4_ref[...]
    out_ref[...] = jax.nn.sigmoid(logits).astype(out_ref.dtype)


# ----------------------------- wrapper ---------------------------------------
def vae_forward(x, eps, p):
    B, I = x.shape
    vmem = lambda: pl.BlockSpec(memory_space=pltpu.MemorySpace.VMEM)
    return pl.pallas_call(
        vae_kernel,
        out_shape=(
            jax.ShapeDtypeStruct((B, I), jnp.float32),   # reconstruction
            jax.ShapeDtypeStruct((1, 1), jnp.float32),   # kl
        ),
        in_specs=[vmem() for _ in range(12)],
        out_specs=(vmem(), vmem()),
    )(
        x, eps,
        p["w1"], p["b1"], p["w21"], p["b21"], p["w22"], p["b22"],
        p["w3"], p["b3"], p["w4"], p["b4"],
    )


# ----------------------------- params / reference ----------------------------
def init_params(key):
    ks = jax.random.split(key, 10)
    s = 0.1

    def lin(kw, kb, fan_in, fan_out):
        # stored PRE-TRANSPOSED: (in_features, out_features)
        return (s * jax.random.normal(kw, (fan_in, fan_out), jnp.float32),
                s * jax.random.normal(kb, (1, fan_out), jnp.float32))

    w1, b1 = lin(ks[0], ks[1], INPUT_SIZE, HIDDEN)
    w21, b21 = lin(ks[2], ks[3], HIDDEN, LATENT)
    w22, b22 = lin(ks[4], ks[5], HIDDEN, LATENT)
    w3, b3 = lin(ks[6], ks[7], LATENT, HIDDEN)
    w4, b4 = lin(ks[8], ks[9], HIDDEN, INPUT_SIZE)
    return dict(w1=w1, b1=b1, w21=w21, b21=b21, w22=w22, b22=b22,
                w3=w3, b3=b3, w4=w4, b4=b4)


def reference_forward(x, eps, p):
    """Pure-JAX reference of the same forward pass (identical eps)."""
    h1 = jnp.maximum(x @ p["w1"] + p["b1"], 0.0)
    mu = h1 @ p["w21"] + p["b21"]
    sigma = h1 @ p["w22"] + p["b22"]
    z = mu + sigma * eps
    kl = 0.5 * jnp.sum(sigma ** 2 + mu ** 2 - jnp.log(sigma ** 2) - 1.0)
    h3 = jnp.maximum(z @ p["w3"] + p["b3"], 0.0)
    recon = jax.nn.sigmoid(h3 @ p["w4"] + p["b4"])
    return recon, kl


# ----------------------------- main ------------------------------------------
if __name__ == "__main__":
    key = jax.random.PRNGKey(0)
    k_x, k_eps, k_p = jax.random.split(key, 3)
    x = jax.random.normal(k_x, (BATCH, INPUT_SIZE), jnp.float32)
    eps = jax.random.normal(k_eps, (BATCH, LATENT), jnp.float32)
    params = init_params(k_p)

    recon, kl = vae_forward(x, eps, params)
    recon = jax.block_until_ready(recon)
    kl = jax.block_until_ready(kl)

    ref_recon, ref_kl = reference_forward(x, eps, params)
    ref_recon = jax.block_until_ready(ref_recon)

    assert recon.shape == (BATCH, INPUT_SIZE)
    assert jnp.allclose(recon, ref_recon, rtol=2e-3, atol=2e-3), (
        float(jnp.max(jnp.abs(recon - ref_recon))))
    assert jnp.allclose(kl[0, 0], ref_kl, rtol=2e-3, atol=1e-2), (
        float(jnp.abs(kl[0, 0] - ref_kl)))

    print("KERNEL_OK")
</pallas_src>

<mosaic_0001>
module attributes {stable_mosaic.version = 11 : i64} {
  func.func @vae_kernel(%arg0: memref<8x16xf32, #tpu.memory_space<vmem>>, %arg1: memref<8x8xf32, #tpu.memory_space<vmem>>, %arg2: memref<16x32xf32, #tpu.memory_space<vmem>>, %arg3: memref<1x32xf32, #tpu.memory_space<vmem>>, %arg4: memref<32x8xf32, #tpu.memory_space<vmem>>, %arg5: memref<1x8xf32, #tpu.memory_space<vmem>>, %arg6: memref<32x8xf32, #tpu.memory_space<vmem>>, %arg7: memref<1x8xf32, #tpu.memory_space<vmem>>, %arg8: memref<8x32xf32, #tpu.memory_space<vmem>>, %arg9: memref<1x32xf32, #tpu.memory_space<vmem>>, %arg10: memref<32x16xf32, #tpu.memory_space<vmem>>, %arg11: memref<1x16xf32, #tpu.memory_space<vmem>>, %arg12: memref<8x16xf32, #tpu.memory_space<vmem>>, %arg13: memref<1x1xf32, #tpu.memory_space<vmem>>) attributes {dimension_semantics = [], scalar_prefetch = 0 : i64, scratch_operands = 0 : i64, tpu.core_type = #tpu.core_type<tc>} {
    %c0 = arith.constant 0 : index
    %c0_0 = arith.constant 0 : index
    %0 = vector.load %arg0[%c0, %c0_0] : memref<8x16xf32, #tpu.memory_space<vmem>>, vector<8x16xf32>
    %c0_1 = arith.constant 0 : index
    %c0_2 = arith.constant 0 : index
    %1 = vector.load %arg2[%c0_1, %c0_2] : memref<16x32xf32, #tpu.memory_space<vmem>>, vector<16x32xf32>
    %cst = arith.constant dense<0.000000e+00> : vector<8x32xf32>
    %2 = tpu.matmul %0, %1, %cst {dimension_numbers = #tpu.dot_dimension_numbers<[1], [0], [0], [1], [0, 0, 1, 1], [], []>} : vector<8x16xf32>, vector<16x32xf32>, vector<8x32xf32> -> vector<8x32xf32>
    %c0_3 = arith.constant 0 : index
    %c0_4 = arith.constant 0 : index
    %3 = vector.load %arg3[%c0_3, %c0_4] : memref<1x32xf32, #tpu.memory_space<vmem>>, vector<1x32xf32>
    %4 = vector.broadcast %3 : vector<1x32xf32> to vector<8x32xf32>
    %5 = arith.addf %2, %4 : vector<8x32xf32>
    %cst_5 = arith.constant 0.000000e+00 : f32
    %6 = vector.broadcast %cst_5 : f32 to vector<8x32xf32>
    %7 = arith.maximumf %5, %6 : vector<8x32xf32>
    %c0_6 = arith.constant 0 : index
    %c0_7 = arith.constant 0 : index
    %8 = vector.load %arg4[%c0_6, %c0_7] : memref<32x8xf32, #tpu.memory_space<vmem>>, vector<32x8xf32>
    %cst_8 = arith.constant dense<0.000000e+00> : vector<8x8xf32>
    %9 = tpu.matmul %7, %8, %cst_8 {dimension_numbers = #tpu.dot_dimension_numbers<[1], [0], [0], [1], [0, 0, 1, 1], [], []>} : vector<8x32xf32>, vector<32x8xf32>, vector<8x8xf32> -> vector<8x8xf32>
    %c0_9 = arith.constant 0 : index
    %c0_10 = arith.constant 0 : index
    %10 = vector.load %arg5[%c0_9, %c0_10] : memref<1x8xf32, #tpu.memory_space<vmem>>, vector<1x8xf32>
    %11 = vector.broadcast %10 : vector<1x8xf32> to vector<8x8xf32>
    %12 = arith.addf %9, %11 : vector<8x8xf32>
    %c0_11 = arith.constant 0 : index
    %c0_12 = arith.constant 0 : index
    %13 = vector.load %arg6[%c0_11, %c0_12] : memref<32x8xf32, #tpu.memory_space<vmem>>, vector<32x8xf32>
    %cst_13 = arith.constant dense<0.000000e+00> : vector<8x8xf32>
    %14 = tpu.matmul %7, %13, %cst_13 {dimension_numbers = #tpu.dot_dimension_numbers<[1], [0], [0], [1], [0, 0, 1, 1], [], []>} : vector<8x32xf32>, vector<32x8xf32>, vector<8x8xf32> -> vector<8x8xf32>
    %c0_14 = arith.constant 0 : index
    %c0_15 = arith.constant 0 : index
    %15 = vector.load %arg7[%c0_14, %c0_15] : memref<1x8xf32, #tpu.memory_space<vmem>>, vector<1x8xf32>
    %16 = vector.broadcast %15 : vector<1x8xf32> to vector<8x8xf32>
    %17 = arith.addf %14, %16 : vector<8x8xf32>
    %c0_16 = arith.constant 0 : index
    %c0_17 = arith.constant 0 : index
    %18 = vector.load %arg1[%c0_16, %c0_17] : memref<8x8xf32, #tpu.memory_space<vmem>>, vector<8x8xf32>
    %19 = arith.mulf %17, %18 : vector<8x8xf32>
    %20 = arith.addf %12, %19 : vector<8x8xf32>
    %21 = arith.mulf %17, %17 : vector<8x8xf32>
    %22 = arith.mulf %12, %12 : vector<8x8xf32>
    %23 = arith.addf %21, %22 : vector<8x8xf32>
    %24 = math.log %21 : vector<8x8xf32>
    %25 = arith.subf %23, %24 : vector<8x8xf32>
    %cst_18 = arith.constant 1.000000e+00 : f32
    %26 = vector.broadcast %cst_18 : f32 to vector<8x8xf32>
    %27 = arith.subf %25, %26 : vector<8x8xf32>
    %28 = vector.shape_cast %27 : vector<8x8xf32> to vector<1x8x8xf32>
    %cst_19 = arith.constant dense<0.000000e+00> : vector<1xf32>
    %29 = vector.multi_reduction <add>, %28, %cst_19 [1, 2] : vector<1x8x8xf32> to vector<1xf32>
    %30 = vector.shape_cast %29 : vector<1xf32> to vector<1x1x1xf32>
    %31 = vector.extract %30[0, 0, 0] : f32 from vector<1x1x1xf32>
    %32 = vector.broadcast %31 : f32 to vector<1x1xf32>
    %cst_20 = arith.constant 5.000000e-01 : f32
    %33 = vector.broadcast %cst_20 : f32 to vector<1x1xf32>
    %34 = arith.mulf %33, %32 : vector<1x1xf32>
    %c0_21 = arith.constant 0 : index
    %c0_22 = arith.constant 0 : index
    %35 = vector.load %arg13[%c0_21, %c0_22] : memref<1x1xf32, #tpu.memory_space<vmem>>, vector<1x1xf32>
    tpu.vector_store %arg13[%c0_21, %c0_22], %34 {strides = array<i32>} : memref<1x1xf32, #tpu.memory_space<vmem>>, vector<1x1xf32>,
    %c0_23 = arith.constant 0 : index
    %c0_24 = arith.constant 0 : index
    %36 = vector.load %arg8[%c0_23, %c0_24] : memref<8x32xf32, #tpu.memory_space<vmem>>, vector<8x32xf32>
    %cst_25 = arith.constant dense<0.000000e+00> : vector<8x32xf32>
    %37 = tpu.matmul %20, %36, %cst_25 {dimension_numbers = #tpu.dot_dimension_numbers<[1], [0], [0], [1], [0, 0, 1, 1], [], []>} : vector<8x8xf32>, vector<8x32xf32>, vector<8x32xf32> -> vector<8x32xf32>
    %c0_26 = arith.constant 0 : index
    %c0_27 = arith.constant 0 : index
    %38 = vector.load %arg9[%c0_26, %c0_27] : memref<1x32xf32, #tpu.memory_space<vmem>>, vector<1x32xf32>
    %39 = vector.broadcast %38 : vector<1x32xf32> to vector<8x32xf32>
    %40 = arith.addf %37, %39 : vector<8x32xf32>
    %cst_28 = arith.constant 0.000000e+00 : f32
    %41 = vector.broadcast %cst_28 : f32 to vector<8x32xf32>
    %42 = arith.maximumf %40, %41 : vector<8x32xf32>
    %c0_29 = arith.constant 0 : index
    %c0_30 = arith.constant 0 : index
    %43 = vector.load %arg10[%c0_29, %c0_30] : memref<32x16xf32, #tpu.memory_space<vmem>>, vector<32x16xf32>
    %cst_31 = arith.constant dense<0.000000e+00> : vector<8x16xf32>
    %44 = tpu.matmul %42, %43, %cst_31 {dimension_numbers = #tpu.dot_dimension_numbers<[1], [0], [0], [1], [0, 0, 1, 1], [], []>} : vector<8x32xf32>, vector<32x16xf32>, vector<8x16xf32> -> vector<8x16xf32>
    %c0_32 = arith.constant 0 : index
    %c0_33 = arith.constant 0 : index
    %45 = vector.load %arg11[%c0_32, %c0_33] : memref<1x16xf32, #tpu.memory_space<vmem>>, vector<1x16xf32>
    %46 = vector.broadcast %45 : vector<1x16xf32> to vector<8x16xf32>
    %47 = arith.addf %44, %46 : vector<8x16xf32>
    %48 = arith.negf %47 : vector<8x16xf32>
    %49 = math.exp %48 : vector<8x16xf32>
    %cst_34 = arith.constant 1.000000e+00 : f32
    %50 = vector.broadcast %cst_34 : f32 to vector<8x16xf32>
    %51 = arith.addf %50, %49 : vector<8x16xf32>
    %52 = arith.divf %50, %51 : vector<8x16xf32>
    %c0_35 = arith.constant 0 : index
    %c0_36 = arith.constant 0 : index
    %53 = vector.load %arg12[%c0_35, %c0_36] : memref<8x16xf32, #tpu.memory_space<vmem>>, vector<8x16xf32>
    tpu.vector_store %arg12[%c0_35, %c0_36], %52 {strides = array<i32>} : memref<8x16xf32, #tpu.memory_space<vmem>>, vector<8x16xf32>,
    return
  }
}

</mosaic_0001>

<bundles_post_ra>
// kernel: tpu_custom_call.1
= control target key start
LH: loop header
LB: loop body
LE: loop exit
PB: predicated region body
PF: predicated region fallthrough
CT: control target
= control target key end

     0   :  { %19 = vsyncpa [#allocation3], 0  ;;  %v681_v2 = vmov 0.0|0.0   ;;  %vm682_vm0 = vmmov 0   ;;  %v683_v4 = vmov 0.0   ;;  %s863_s0 = inlined_call_operand.vmem [shape: f32[8,16], index: 0, kind: input, shape index: {}]   ;;  %s864_s1 = inlined_call_operand.vmem [shape: f32[8,8], index: 1, kind: input, shape index: {}]   ;;  %s865_s2 = inlined_call_operand.vmem [shape: f32[16,32], index: 2, kind: input, shape index: {}]   ;;  %s866_s3 = inlined_call_operand.vmem [shape: f32[1,32], index: 3, kind: input, shape index: {}]   ;;  %s867_s4 = inlined_call_operand.vmem [shape: f32[32,8], index: 4, kind: input, shape index: {}]   ;;  %s868_s5 = inlined_call_operand.vmem [shape: f32[1,8], index: 5, kind: input, shape index: {}]   ;;  %s869_s6 = inlined_call_operand.vmem [shape: f32[32,8], index: 6, kind: input, shape index: {}]   ;;  %s870_s7 = inlined_call_operand.vmem [shape: f32[1,8], index: 7, kind: input, shape index: {}]   ;;  %s871_s8 = inlined_call_operand.vmem [shape: f32[8,32], index: 8, kind: input, shape index: {}]   ;;  %s872_s9 = inlined_call_operand.vmem [shape: f32[1,32], index: 9, kind: input, shape index: {}]   ;;  %s873_s10 = inlined_call_operand.vmem [shape: f32[32,16], index: 10, kind: input, shape index: {}]   ;;  %s874_s11 = inlined_call_operand.vmem [shape: f32[1,16], index: 11, kind: input, shape index: {}]   ;;  %s875_s12 = inlined_call_operand.hbm [shape: f32[8,16], index: 12, kind: output, shape index: {0}]   ;;  %s876_s13 = inlined_call_operand.hbm [shape: f32[1,1], index: 13, kind: output, shape index: {1}]  }
   0x1   :  { %v46_v0 = vld [vmem:[%s865_s2] sm:$0xff]  ;;  %v47_v1 = vld [vmem:[%s865_s2 + $0x8] sm:$0xff]  ;;  %599 = vmatprep.subr.bf16.mxu1 %v681_v2  ;;  %558 = vmatprep.mubr.msk.f32.mxu1 %vm682_vm0, %v683_v4 }
   0x2   :  { %v600_v3 = vpack.c.bf16 %v47_v1, %v46_v0  ;;  %v130_v5 = vld [vmem:[%s867_s4] sm:$0xff]  ;;  %v131_v6 = vld [vmem:[%s867_s4 + $0x8] sm:$0xff]  ;;  %608 = vmatprep.subr.bf16.mxu0 %v681_v2  ;;  %580 = vmatprep.mubr.msk.f32.mxu0 %vm682_vm0, %v683_v4 }
   0x3   :  { %v215_v7 = vld [vmem:[%s869_s6] sm:$0xff]  ;;  %v216_v8 = vld [vmem:[%s869_s6 + $0x8] sm:$0xff] }
   0x4   :  { %20 = vsyncpa [#allocation5], 0  ;;  %601 = vmatpush3.bf16.msra.mxu1 %v600_v3  ;;  %v45_v9 = vld [vmem:[%s863_s0] sm:$0xff]  ;;  %vm55_vm1 = vcmask 130048   ;;  %v603_v10 = vpack.c.bf16 %v131_v6, %v130_v5  ;;  %v609_v11 = vpack.c.bf16 %v216_v8, %v215_v7  ;;  %v132_v12 = vld [vmem:[%s867_s4 + $0x10] sm:$0xff]  ;;  %vm141_vm2 = vcmask 261120  }
   0x5   :  { %602 = vmatprep.subr.bf16.mxu1 %v681_v2  ;;  %v133_v13 = vld [vmem:[%s867_s4 + $0x18] sm:$0xff]  ;;  %v217_v14 = vld [vmem:[%s869_s6 + $0x10] sm:$0xff]  ;;  %v522_v18 = vld [vmem:[%s866_s3] ss:$0 sm:$0xff]  ;;  %vm306_vm3 = vcmask 64512   ;;  %vm319_vm4 = vcmask 0  }
   0x6   :  { %610 = vmatpush3.bf16.msra.mxu0 %v609_v11  ;;  %v606_v15 = vpack.c.bf16 %v133_v13, %v132_v12  ;;  %v218_v16 = vld [vmem:[%s869_s6 + $0x18] sm:$0xff]  ;;  %v321_v23 = vld [vmem:[%s871_s8] sm:$0xff]  ;;  %v404_v44 = vld [vmem:[%s873_s10 + $0x8] sm:$0xff]  ;;  %s684_s0 = smov [#allocation4]  }
   0x7   :  { %559 = vmatmul.mubr.msk.f32.vlgmr.msra.gmra.mrb[0].mxu1 %vm55_vm1, %v45_v9  ;;  %611 = vmatprep.subr.bf16.mxu0 %v681_v2  ;;  %v612_v17 = vpack.c.bf16 %v218_v16, %v217_v14  ;;  %v524_v24 = vld [vmem:[%s868_s5] ss:$0 sm:$0xff]  ;;  %v405_v46 = vld [vmem:[%s873_s10 + $0x10] sm:$0xff]  ;;  %v406_v47 = vld [vmem:[%s873_s10 + $0x18] sm:$0xff]  ;;  %s510_s23 = sshll.u32 %s684_s0, 4  ;;  %s511_s23 = int_to_ptr.vmem [resolvable:$true] %s510_s23 }
   0x8   :  { %604 = vmatpush3.bf16.msra.mxu1 %v603_v10  ;;  %569 = vmatprep.mubr.msk.f32.mxu1 %vm682_vm0, %v683_v4  ;;  %v526_v25 = vld [vmem:[%s870_s7] ss:$0 sm:$0xff]  ;;  %v618_v48 = vpack.c.bf16 %v406_v47, %v405_v46  ;;  %s633_s24 = scalar_lea.vmem %s511_s23, 16  ;;  %s637_s25 = scalar_lea.vmem %s511_s23, 32 }
   0x9   :  { %605 = vmatprep.subr.bf16.mxu1 %v681_v2  ;;  %v296_v28 = vld [vmem:[%s864_s1] sm:$0xff]  ;;  %p634_p0 = scmp.ne.s32.totalorder %s511_s23, %s633_s24  ;;  %p638_p1 = scmp.lt.s32.totalorder %s511_s23, %s511_s23 }
   0xa   :  { %613 = vmatpush3.bf16.msra.mxu0 %v612_v17  ;;  %v403_v43 = vld [vmem:[%s873_s10] sm:$0xff]  ;;  %p639_p2 = scmp.lt.s32.totalorder %s637_s25, %s633_s24 }
   0xb   :  { %614 = vmatprep.subr.bf16.mxu0 %v681_v2  ;;  %v615_v45 = vpack.c.bf16 %v404_v44, %v403_v43  ;;  %v529_v56 = vld [vmem:[%s872_s9] ss:$0 sm:$0xff] }
   0xc   :  { %607 = vmatpush3.bf16.msra.mxu1 %v606_v15  ;;  %p640_p3 = por %p639_p2, %p638_p1 }
   0xd   :  { %583 = vmatprep.subr.mxu1 %v683_v4 }
   0xe   :  { %p641_p4 = pnand %p640_p3, %p634_p0 }
  0xda   :  { %v125_v19 = vpop.f32.mrb[0].mxu1 }
  0xdb   :  { %v126_v20 = vadd.f32 %v522_v18, %v125_v19  ;;  %v560_v21 = vpop.f32.mrb[1].mxu1 }
  0xdd   :  { %v129_v22 = vmax.f32 %v126_v20, 0.0 }
  0xdf   :  { %570 = vmatmul.mubr.msk.f32.vlgmr.msra.gmra.mrb[2].mxu1 %vm141_vm2, %v129_v22  ;;  %581 = vmatmul.mubr.msk.f32.vlgmr.msra.gmra.mrb[0].mxu0 %vm141_vm2, %v129_v22 }
  0xe0   :  { %585 = vmatprep.mubr.msk.f32.mxu1 %vm682_vm0, %v683_v4  ;;  %596 = vmatprep.mubr.msk.f32.mxu0 %vm682_vm0, %v683_v4 }
  0xe1   :  { %584 = vmatpush3.msra.mxu1 %v321_v23  ;;  %616 = vmatpush3.bf16.msra.mxu0 %v615_v45 }
  0xe2   :  { %617 = vmatprep.subr.bf16.mxu0 %v681_v2 }
  0xe5   :  { %619 = vmatpush3.bf16.msra.mxu0 %v618_v48 }
 0x1b2   :  { %v211_v26 = vpop.f32.mrb[2].mxu1  ;;  %v292_v27 = vpop.f32.mrb[0].mxu0 }
 0x1b3   :  { %v212_v29 = vadd.f32 %v524_v24, %v211_v26  ;;  %v293_v30 = vadd.f32 %v526_v25, %v292_v27  ;;  %v571_v31 = vpop.f32.mrb[3].mxu1  ;;  %v582_v32 = vpop.f32.mrb[1].mxu0 }
 0x1b5   :  { %v300_v33 = vmul.f32 %v212_v29, %v212_v29  ;;  %v297_v34 = vmul.f32 %v296_v28, %v293_v30  ;;  %v299_v35 = vmul.f32 %v293_v30, %v293_v30 }
 0x1b7   :  { %v298_v36 = vadd.f32 %v297_v34, %v212_v29  ;;  %627 = vlog2.f32 %v299_v35  ;;  %v301_v37 = vadd.f32 %v300_v33, %v299_v35 }
 0x1b9   :  { %586 = vmatmul.mubr.msk.f32.vlgmr.msra.gmra.mrb[4].mxu1 %vm306_vm3, %v298_v36 }
 0x1c1   :  { %v628_v38 = vpop.eup %627 }
 0x1c2   :  { %v303_v39 = vmul.f32 0.6931472, %v628_v38 }
 0x1c4   :  { %v304_v40 = vsub.f32 %v301_v37, %v303_v39 }
 0x1c6   :  { %v528_v41 = vadd.f32 -1.0, %v304_v40 }
 0x1c8   :  { %v307_v42 = vsel %vm306_vm3, %v528_v41, 0.0 }
 0x1c9   :  { %308 = vadd.xlane.f32.xlu0 %v307_v42 }
 0x256   :  { %v309_v49 = vpop.xlane.xlu0 %308 }
 0x257   :  { %v310_v50 = vrot.slane %v309_v49, 4 }
 0x259   :  { %v311_v51 = vadd.f32 %v310_v50, %v309_v49 }
 0x25b   :  { %v312_v52 = vrot.slane %v311_v51, 2 }
 0x25d   :  { %v313_v53 = vadd.f32 %v312_v52, %v311_v51 }
 0x25f   :  { %v314_v54 = vrot.slane %v313_v53, 1 }
 0x261   :  { %v315_v55 = vadd.f32 %v314_v54, %v313_v53 }
 0x263   :  { %620 = vpush %v315_v55 }
 0x28c   :  { %v398_v57 = vpop.f32.mrb[4].mxu1 }
 0x28d   :  { %v399_v58 = vadd.f32 %v529_v56, %v398_v57  ;;  %v587_v59 = vpop.f32.mrb[5].mxu1 }
 0x28f   :  { %v402_v60 = vmax.f32 %v399_v58, 0.0 }
 0x291   :  { %597 = vmatmul.mubr.msk.f32.vlgmr.msra.gmra.mrb[2].mxu0 %vm141_vm2, %v402_v60 }
 0x294   :  { %s621_s10 = spop %620 }
 0x295   :  { %v317_v61 = vstv %s621_s10 }
 0x296   :  { %v318_v62 = vmul.f32 0.5, %v317_v61 }
 0x298   :  { %320 = vst.msk [vmem:[#allocation4] sm:$0x1] %vm319_vm4, %v318_v62 }
 0x299   :  { %644 = shalt.err (!%p641_p4)
}
 0x29a   :  { %s645_s27 = scalar_lea.hbm %s876_s13, 16 }
 0x29b   :  { %p646_p5 = scmp.ne.s32.totalorder %s876_s13, %s645_s27  ;;  %p649_p6 = scmp.lt.u32.totalorder %s645_s27, %s876_s13 }
 0x29d   :  { %p651_p7 = pnand %p649_p6, %p646_p5 }
 0x29f   :  { %654 = shalt.err (!%p651_p7)
}
 0x2a0   :  { %513 = dma.vmem_to_hbm [thread:$0]  %s511_s23, 16, %s876_s13, [#allocation5]   ;;  %v531_v63 = vld [vmem:[%s874_s11] ss:$0 sm:$0xff] }
 0x2a1   :  { %s685_s16 = smov [#allocation2]  }
 0x2a2   :  { %s500_s17 = sshll.u32 %s685_s16, 4  ;;  %s501_s17 = int_to_ptr.vmem [resolvable:$true] %s500_s17 }
 0x2a3   :  { %s655_s5 = scalar_lea.vmem %s501_s17, 128  ;;  %p660_p9 = scmp.lt.s32.totalorder %s501_s17, %s501_s17 }
 0x2a4   :  { %p656_p8 = scmp.ne.s32.totalorder %s501_s17, %s655_s5  ;;  %p661_p10 = scmp.lt.s32.totalorder %s655_s5, %s655_s5 }
 0x2a6   :  { %p662_p11 = por %p661_p10, %p660_p9 }
 0x2a8   :  { %p663_p12 = pnand %p662_p11, %p656_p8 }
 0x364   :  { %v483_v0 = vpop.f32.mrb[2].mxu0 }
 0x365   :  { %v484_v1 = vadd.f32 %v531_v63, %v483_v0  ;;  %v598_v2 = vpop.f32.mrb[3].mxu0 }
 0x367   :  { %v533_v3 = vmul.f32 -1.442695, %v484_v1 }
 0x369   :  { %629 = vpow2.f32 %v533_v3 }
 0x373   :  { %v630_v4 = vpop.eup %629 }
 0x374   :  { %v490_v5 = vadd.f32 1.0, %v630_v4 }
 0x376   :  { %631 = vrcp.f32 %v490_v5 }
 0x380   :  { %v632_v6 = vpop.eup %631 }
 0x381   :  { %493 = vst.msk [vmem:[#allocation2] sm:$0xff] %vm55_vm1, %v632_v6 }
 0x382   :  { %666 = shalt.err (!%p663_p12)
}
 0x383   :  { %s667_s1 = scalar_lea.hbm %s875_s12, 128 }
 0x384   :  { %p668_p13 = scmp.ne.s32.totalorder %s875_s12, %s667_s1  ;;  %p671_p0 = scmp.lt.u32.totalorder %s667_s1, %s875_s12 }
 0x386   :  { %p673_p1 = pnand %p671_p0, %p668_p13 }
 0x388   :  { %676 = shalt.err (!%p673_p1)
}
 0x389   :  { %503 = dma.vmem_to_hbm [thread:$0]  %s501_s17, 128, %s875_s12, [#allocation3]  }
 0x38a   :  { %677 = dma.done.wait [#allocation3], 128  }
 0x38b   :  { %678 = vsyncadd [#allocation3], 4294967168 }
 0x38c   :  { %679 = dma.done.wait [#allocation5], 16  }
 0x38d   :  { %680 = vsyncadd [#allocation5], 4294967280 }
 0x38e   :  { %520 = vsyncpa [#allocation3], 1 }
 0x38f   :  { %521 = vsyncpa [#allocation5], 1 }

</bundles_post_ra>
